<compile_context>
chip_gen: v5e
topology: v5e:2x2
jax: 0.10.0
libtpu: 0.0.40
codegen_flags: <defaults>
</compile_context>

<pallas_src>
import functools
import math

import jax
import jax.numpy as jnp
from jax.experimental import pallas as pl
from jax.experimental.pallas import tpu as pltpu


def _layernorm_kernel(x_ref, a_ref, b_ref, o_ref, *, eps, features, groups):
    # x_ref / o_ref: (block_rows, groups * features)  (lane-dense when packed)
    # a_ref / b_ref: (1, features), already float32.
    a = a_ref[...]
    b = b_ref[...]
    inv_nm1 = jnp.float32(1.0 / (features - 1))
    eps_f = jnp.float32(eps)
    for j in range(groups):          # static, unrolled; groups is small (<= 16)
        lo = j * features
        xs = x_ref[:, lo:lo + features].astype(jnp.float32)
        mean = jnp.mean(xs, axis=-1, keepdims=True)
        diff = xs - mean
        var = jnp.sum(diff * diff, axis=-1, keepdims=True) * inv_nm1
        # Exact per-row divide; operand is only (block_rows, 1) so this is
        # negligible in a memory-bound kernel.
        inv = 1.0 / (jnp.sqrt(var) + eps_f)
        o_ref[:, lo:lo + features] = (diff * inv * a + b).astype(o_ref.dtype)


def _round_up(n, m):
    return ((n + m - 1) // m) * m


def _vmem_config():
    """Returns (target bytes per pipelined I/O buffer, vmem_limit_bytes)."""
    cap = None
    try:
        cap = int(pltpu.get_tpu_info().vmem_capacity_bytes)
    except Exception:
        cap = None
    if cap is not None and cap >= (100 << 20):
        # v5e / v6e: 128 MiB VMEM per TensorCore -> big buffers, high limit.
        return 8 << 20, 96 << 20
    # v7x (64 MiB / TC) or unknown: conservative config.
    return 4 << 20, 44 << 20


def _auto_block_rows(rows_t, lane_w, itemsize, target_buf, vmem_budget,
                     requested=None):
    # Rows allowed by total VMEM budget: 2x double-buffered (in + out) blocks
    # plus ~5 f32 tile-sized intermediates, with 2 MiB headroom.  If this would
    # overflow the budget we shrink the tile (never clamp the declared limit
    # below the real need).
    per_row_vmem = 4 * lane_w * itemsize + 5 * lane_w * 4
    budget_rows = max(8, (vmem_budget - (2 << 20)) // per_row_vmem)
    if requested is None:
        br = target_buf // max(1, lane_w * itemsize)
    else:
        br = int(requested)
    br = min(br, budget_rows)
    br = max(8, (int(br) // 8) * 8)
    br = min(br, _round_up(rows_t, 8))
    if rows_t < 8:
        br = rows_t          # full-extent block is always legal
    return int(br)


def layer_norm(x, a_2, b_2, eps=1e-6, block_rows=None):
    """x: (..., F). a_2, b_2: (F,). Normalizes over the last axis."""
    orig_shape = x.shape
    F_ = int(orig_shape[-1])
    assert F_ > 1, "unbiased std (ddof=1) requires features > 1"
    rows = int(math.prod(orig_shape[:-1])) if len(orig_shape) > 1 else 1
    x2d = x.reshape(rows, F_)

    a32 = a_2.astype(jnp.float32).reshape(1, F_)
    b32 = b_2.astype(jnp.float32).reshape(1, F_)

    # Lane packing: if F divides 128 (and rows pack evenly), view g = 128/F
    # consecutive rows as one 128-lane row so HBM loads/stores are unmasked
    # lane-dense.  Otherwise fall back to the plain (rows, F) layout (still
    # correct; stores are masked if F % 128 != 0).
    groups = 1
    if F_ >= 8 and F_ < 128 and 128 % F_ == 0 and rows % (128 // F_) == 0:
        groups = 128 // F_
    lane_w = groups * F_
    rows_t = rows // groups
    x_t = x2d.reshape(rows_t, lane_w)

    itemsize = jnp.dtype(x.dtype).itemsize
    target_buf, vmem_limit = _vmem_config()
    block_rows = _auto_block_rows(rows_t, lane_w, itemsize, target_buf,
                                  vmem_limit, requested=block_rows)

    grid = (pl.cdiv(rows_t, block_rows),)   # ragged tail handled by Pallas masking

    cost = pl.CostEstimate(
        flops=7 * rows * F_,
        transcendentals=2 * rows,
        bytes_accessed=2 * rows * F_ * itemsize + 2 * F_ * 4,
    )

    out = pl.pallas_call(
        functools.partial(_layernorm_kernel, eps=float(eps), features=F_,
                          groups=groups),
        out_shape=jax.ShapeDtypeStruct((rows_t, lane_w), x.dtype),
        grid_spec=pltpu.PrefetchScalarGridSpec(
            num_scalar_prefetch=0,
            grid=grid,
            in_specs=[
                pl.BlockSpec((block_rows, lane_w), lambda i: (i, 0)),
                pl.BlockSpec((1, F_), lambda i: (0, 0)),
                pl.BlockSpec((1, F_), lambda i: (0, 0)),
            ],
            out_specs=pl.BlockSpec((block_rows, lane_w), lambda i: (i, 0)),
        ),
        compiler_params=pltpu.CompilerParams(
            dimension_semantics=("parallel",),
            vmem_limit_bytes=int(vmem_limit),
        ),
        cost_estimate=cost,
    )(x_t, a32, b32)

    return out.reshape(orig_shape)


def _reference(x, a_2, b_2, eps):
    F_ = x.shape[-1]
    mean = jnp.mean(x, axis=-1, keepdims=True)
    std = jnp.sqrt(jnp.sum((x - mean) ** 2, axis=-1, keepdims=True) / (F_ - 1))
    return a_2 * (x - mean) / (std + eps) + b_2


if __name__ == "__main__":
    key = jax.random.PRNGKey(0)
    eps = 1e-6

    # Main check: shapes implied by the Transformer module (B, S, F).
    # rows=16 packs 4 rows per 128-lane row -> lane-dense packed path.
    B, S, F = 2, 8, 32
    x = jax.random.normal(key, (B, S, F), dtype=jnp.float32)
    a_2 = jnp.ones((F,), dtype=jnp.float32)   # nn.Parameter(torch.ones(features))
    b_2 = jnp.zeros((F,), dtype=jnp.float32)  # nn.Parameter(torch.zeros(features))

    y = jax.block_until_ready(layer_norm(x, a_2, b_2, eps=eps))
    ref = _reference(x, a_2, b_2, eps)
    assert y.shape == x.shape and y.dtype == x.dtype
    assert jnp.allclose(y, ref, atol=1e-5, rtol=1e-5), "mismatch vs reference"

    # Ragged-tail / unpacked path: 21 rows (not divisible by g=4), explicit
    # block_rows=8 -> 3 grid steps, last one partial (masked tail writes).
    x2 = jax.random.normal(jax.random.PRNGKey(0), (3, 7, F), dtype=jnp.float32)
    y2 = jax.block_until_ready(layer_norm(x2, a_2, b_2, eps=eps, block_rows=8))
    ref2 = _reference(x2, a_2, b_2, eps)
    assert y2.shape == x2.shape
    assert jnp.allclose(y2, ref2, atol=1e-5, rtol=1e-5), "ragged-tail mismatch"

    # Lane-dense unpacked path: F already a multiple of 128.
    F3 = 128
    x3 = jax.random.normal(jax.random.PRNGKey(1), (2, 8, F3), dtype=jnp.float32)
    a3 = jnp.ones((F3,), dtype=jnp.float32)
    b3 = jnp.zeros((F3,), dtype=jnp.float32)
    y3 = jax.block_until_ready(layer_norm(x3, a3, b3, eps=eps))
    ref3 = _reference(x3, a3, b3, eps)
    assert y3.shape == x3.shape
    assert jnp.allclose(y3, ref3, atol=1e-5, rtol=1e-5), "F=128 mismatch"

    print("KERNEL_OK")
</pallas_src>

<mosaic_0001>
module attributes {stable_mosaic.version = 11 : i64} {
  func.func @_layernorm_kernel(%arg0: i32, %arg1: memref<4x128xf32, #tpu.memory_space<vmem>>, %arg2: memref<1x32xf32, #tpu.memory_space<vmem>>, %arg3: memref<1x32xf32, #tpu.memory_space<vmem>>, %arg4: memref<4x128xf32, #tpu.memory_space<vmem>>) attributes {dimension_semantics = [#tpu.dimension_semantics<parallel>], iteration_bounds = array<i64: 1>, scalar_prefetch = 0 : i64, scratch_operands = 0 : i64, tpu.core_type = #tpu.core_type<tc>, window_params = [{transform_indices = @transform_0, window_bounds = array<i64: 4, 128>}, {pipeline_mode = #tpu.pipeline_mode<synchronous>, transform_indices = @transform_1, window_bounds = array<i64: 1, 32>}, {pipeline_mode = #tpu.pipeline_mode<synchronous>, transform_indices = @transform_2, window_bounds = array<i64: 1, 32>}, {transform_indices = @transform_3, window_bounds = array<i64: 4, 128>}]} {
    %c0 = arith.constant 0 : index
    %c0_0 = arith.constant 0 : index
    %0 = vector.load %arg2[%c0, %c0_0] : memref<1x32xf32, #tpu.memory_space<vmem>>, vector<1x32xf32>
    %c0_1 = arith.constant 0 : index
    %c0_2 = arith.constant 0 : index
    %1 = vector.load %arg3[%c0_1, %c0_2] : memref<1x32xf32, #tpu.memory_space<vmem>>, vector<1x32xf32>
    %c0_3 = arith.constant 0 : index
    %c0_4 = arith.constant 0 : index
    %2 = vector.load %arg1[%c0_3, %c0_4] : memref<4x128xf32, #tpu.memory_space<vmem>>, vector<4x32xf32>
    %cst = arith.constant dense<0.000000e+00> : vector<4xf32>
    %3 = vector.multi_reduction <add>, %2, %cst [1] : vector<4x32xf32> to vector<4xf32>
    %4 = vector.shape_cast %3 : vector<4xf32> to vector<4x1xf32>
    %cst_5 = arith.constant 3.200000e+01 : f32
    %5 = vector.broadcast %cst_5 : f32 to vector<4x1xf32>
    %6 = arith.divf %4, %5 : vector<4x1xf32>
    %7 = vector.broadcast %6 : vector<4x1xf32> to vector<4x32xf32>
    %8 = arith.subf %2, %7 : vector<4x32xf32>
    %9 = arith.mulf %8, %8 : vector<4x32xf32>
    %cst_6 = arith.constant dense<0.000000e+00> : vector<4xf32>
    %10 = vector.multi_reduction <add>, %9, %cst_6 [1] : vector<4x32xf32> to vector<4xf32>
    %11 = vector.shape_cast %10 : vector<4xf32> to vector<4x1xf32>
    %cst_7 = arith.constant 0.0322580636 : f32
    %12 = vector.broadcast %cst_7 : f32 to vector<4x1xf32>
    %13 = arith.mulf %11, %12 : vector<4x1xf32>
    %14 = math.sqrt %13 : vector<4x1xf32>
    %cst_8 = arith.constant 9.99999997E-7 : f32
    %15 = vector.broadcast %cst_8 : f32 to vector<4x1xf32>
    %16 = arith.addf %14, %15 : vector<4x1xf32>
    %cst_9 = arith.constant 1.000000e+00 : f32
    %17 = vector.broadcast %cst_9 : f32 to vector<4x1xf32>
    %18 = arith.divf %17, %16 : vector<4x1xf32>
    %19 = vector.broadcast %18 : vector<4x1xf32> to vector<4x32xf32>
    %20 = arith.mulf %8, %19 : vector<4x32xf32>
    %21 = vector.broadcast %0 : vector<1x32xf32> to vector<4x32xf32>
    %22 = arith.mulf %20, %21 : vector<4x32xf32>
    %23 = vector.broadcast %1 : vector<1x32xf32> to vector<4x32xf32>
    %24 = arith.addf %22, %23 : vector<4x32xf32>
    %c0_10 = arith.constant 0 : index
    %c0_11 = arith.constant 0 : index
    %25 = vector.load %arg4[%c0_10, %c0_11] : memref<4x128xf32, #tpu.memory_space<vmem>>, vector<4x32xf32>
    tpu.vector_store %arg4[%c0_10, %c0_11], %24 {strides = array<i32>} : memref<4x128xf32, #tpu.memory_space<vmem>>, vector<4x32xf32>,
    %c0_12 = arith.constant 0 : index
    %c32 = arith.constant 32 : index
    %26 = vector.load %arg1[%c0_12, %c32] : memref<4x128xf32, #tpu.memory_space<vmem>>, vector<4x32xf32>
    %cst_13 = arith.constant dense<0.000000e+00> : vector<4xf32>
    %27 = vector.multi_reduction <add>, %26, %cst_13 [1] : vector<4x32xf32> to vector<4xf32>
    %28 = vector.shape_cast %27 : vector<4xf32> to vector<4x1xf32>
    %cst_14 = arith.constant 3.200000e+01 : f32
    %29 = vector.broadcast %cst_14 : f32 to vector<4x1xf32>
    %30 = arith.divf %28, %29 : vector<4x1xf32>
    %31 = vector.broadcast %30 : vector<4x1xf32> to vector<4x32xf32>
    %32 = arith.subf %26, %31 : vector<4x32xf32>
    %33 = arith.mulf %32, %32 : vector<4x32xf32>
    %cst_15 = arith.constant dense<0.000000e+00> : vector<4xf32>
    %34 = vector.multi_reduction <add>, %33, %cst_15 [1] : vector<4x32xf32> to vector<4xf32>
    %35 = vector.shape_cast %34 : vector<4xf32> to vector<4x1xf32>
    %cst_16 = arith.constant 0.0322580636 : f32
    %36 = vector.broadcast %cst_16 : f32 to vector<4x1xf32>
    %37 = arith.mulf %35, %36 : vector<4x1xf32>
    %38 = math.sqrt %37 : vector<4x1xf32>
    %cst_17 = arith.constant 9.99999997E-7 : f32
    %39 = vector.broadcast %cst_17 : f32 to vector<4x1xf32>
    %40 = arith.addf %38, %39 : vector<4x1xf32>
    %cst_18 = arith.constant 1.000000e+00 : f32
    %41 = vector.broadcast %cst_18 : f32 to vector<4x1xf32>
    %42 = arith.divf %41, %40 : vector<4x1xf32>
    %43 = vector.broadcast %42 : vector<4x1xf32> to vector<4x32xf32>
    %44 = arith.mulf %32, %43 : vector<4x32xf32>
    %45 = vector.broadcast %0 : vector<1x32xf32> to vector<4x32xf32>
    %46 = arith.mulf %44, %45 : vector<4x32xf32>
    %47 = vector.broadcast %1 : vector<1x32xf32> to vector<4x32xf32>
    %48 = arith.addf %46, %47 : vector<4x32xf32>
    %c0_19 = arith.constant 0 : index
    %c32_20 = arith.constant 32 : index
    %49 = vector.load %arg4[%c0_19, %c32_20] : memref<4x128xf32, #tpu.memory_space<vmem>>, vector<4x32xf32>
    tpu.vector_store %arg4[%c0_19, %c32_20], %48 {strides = array<i32>} : memref<4x128xf32, #tpu.memory_space<vmem>>, vector<4x32xf32>,
    %c0_21 = arith.constant 0 : index
    %c64 = arith.constant 64 : index
    %50 = vector.load %arg1[%c0_21, %c64] : memref<4x128xf32, #tpu.memory_space<vmem>>, vector<4x32xf32>
    %cst_22 = arith.constant dense<0.000000e+00> : vector<4xf32>
    %51 = vector.multi_reduction <add>, %50, %cst_22 [1] : vector<4x32xf32> to vector<4xf32>
    %52 = vector.shape_cast %51 : vector<4xf32> to vector<4x1xf32>
    %cst_23 = arith.constant 3.200000e+01 : f32
    %53 = vector.broadcast %cst_23 : f32 to vector<4x1xf32>
    %54 = arith.divf %52, %53 : vector<4x1xf32>
    %55 = vector.broadcast %54 : vector<4x1xf32> to vector<4x32xf32>
    %56 = arith.subf %50, %55 : vector<4x32xf32>
    %57 = arith.mulf %56, %56 : vector<4x32xf32>
    %cst_24 = arith.constant dense<0.000000e+00> : vector<4xf32>
    %58 = vector.multi_reduction <add>, %57, %cst_24 [1] : vector<4x32xf32> to vector<4xf32>
    %59 = vector.shape_cast %58 : vector<4xf32> to vector<4x1xf32>
    %cst_25 = arith.constant 0.0322580636 : f32
    %60 = vector.broadcast %cst_25 : f32 to vector<4x1xf32>
    %61 = arith.mulf %59, %60 : vector<4x1xf32>
    %62 = math.sqrt %61 : vector<4x1xf32>
    %cst_26 = arith.constant 9.99999997E-7 : f32
    %63 = vector.broadcast %cst_26 : f32 to vector<4x1xf32>
    %64 = arith.addf %62, %63 : vector<4x1xf32>
    %cst_27 = arith.constant 1.000000e+00 : f32
    %65 = vector.broadcast %cst_27 : f32 to vector<4x1xf32>
    %66 = arith.divf %65, %64 : vector<4x1xf32>
    %67 = vector.broadcast %66 : vector<4x1xf32> to vector<4x32xf32>
    %68 = arith.mulf %56, %67 : vector<4x32xf32>
    %69 = vector.broadcast %0 : vector<1x32xf32> to vector<4x32xf32>
    %70 = arith.mulf %68, %69 : vector<4x32xf32>
    %71 = vector.broadcast %1 : vector<1x32xf32> to vector<4x32xf32>
    %72 = arith.addf %70, %71 : vector<4x32xf32>
    %c0_28 = arith.constant 0 : index
    %c64_29 = arith.constant 64 : index
    %73 = vector.load %arg4[%c0_28, %c64_29] : memref<4x128xf32, #tpu.memory_space<vmem>>, vector<4x32xf32>
    tpu.vector_store %arg4[%c0_28, %c64_29], %72 {strides = array<i32>} : memref<4x128xf32, #tpu.memory_space<vmem>>, vector<4x32xf32>,
    %c0_30 = arith.constant 0 : index
    %c96 = arith.constant 96 : index
    %74 = vector.load %arg1[%c0_30, %c96] : memref<4x128xf32, #tpu.memory_space<vmem>>, vector<4x32xf32>
    %cst_31 = arith.constant dense<0.000000e+00> : vector<4xf32>
    %75 = vector.multi_reduction <add>, %74, %cst_31 [1] : vector<4x32xf32> to vector<4xf32>
    %76 = vector.shape_cast %75 : vector<4xf32> to vector<4x1xf32>
    %cst_32 = arith.constant 3.200000e+01 : f32
    %77 = vector.broadcast %cst_32 : f32 to vector<4x1xf32>
    %78 = arith.divf %76, %77 : vector<4x1xf32>
    %79 = vector.broadcast %78 : vector<4x1xf32> to vector<4x32xf32>
    %80 = arith.subf %74, %79 : vector<4x32xf32>
    %81 = arith.mulf %80, %80 : vector<4x32xf32>
    %cst_33 = arith.constant dense<0.000000e+00> : vector<4xf32>
    %82 = vector.multi_reduction <add>, %81, %cst_33 [1] : vector<4x32xf32> to vector<4xf32>
    %83 = vector.shape_cast %82 : vector<4xf32> to vector<4x1xf32>
    %cst_34 = arith.constant 0.0322580636 : f32
    %84 = vector.broadcast %cst_34 : f32 to vector<4x1xf32>
    %85 = arith.mulf %83, %84 : vector<4x1xf32>
    %86 = math.sqrt %85 : vector<4x1xf32>
    %cst_35 = arith.constant 9.99999997E-7 : f32
    %87 = vector.broadcast %cst_35 : f32 to vector<4x1xf32>
    %88 = arith.addf %86, %87 : vector<4x1xf32>
    %cst_36 = arith.constant 1.000000e+00 : f32
    %89 = vector.broadcast %cst_36 : f32 to vector<4x1xf32>
    %90 = arith.divf %89, %88 : vector<4x1xf32>
    %91 = vector.broadcast %90 : vector<4x1xf32> to vector<4x32xf32>
    %92 = arith.mulf %80, %91 : vector<4x32xf32>
    %93 = vector.broadcast %0 : vector<1x32xf32> to vector<4x32xf32>
    %94 = arith.mulf %92, %93 : vector<4x32xf32>
    %95 = vector.broadcast %1 : vector<1x32xf32> to vector<4x32xf32>
    %96 = arith.addf %94, %95 : vector<4x32xf32>
    %c0_37 = arith.constant 0 : index
    %c96_38 = arith.constant 96 : index
    %97 = vector.load %arg4[%c0_37, %c96_38] : memref<4x128xf32, #tpu.memory_space<vmem>>, vector<4x32xf32>
    tpu.vector_store %arg4[%c0_37, %c96_38], %96 {strides = array<i32>} : memref<4x128xf32, #tpu.memory_space<vmem>>, vector<4x32xf32>,
    return
  }
  func.func @transform_0(%arg0: i32) -> (i32, i32) {
    %c0_i32 = arith.constant 0 : i32
    %c0_i32_0 = arith.constant 0 : i32
    return %arg0, %c0_i32 : i32, i32
  }
  func.func @transform_1(%arg0: i32) -> (i32, i32) {
    %c0_i32 = arith.constant 0 : i32
    %c0_i32_0 = arith.constant 0 : i32
    %c0_i32_1 = arith.constant 0 : i32
    return %c0_i32, %c0_i32_0 : i32, i32
  }
  func.func @transform_2(%arg0: i32) -> (i32, i32) {
    %c0_i32 = arith.constant 0 : i32
    %c0_i32_0 = arith.constant 0 : i32
    %c0_i32_1 = arith.constant 0 : i32
    return %c0_i32, %c0_i32_0 : i32, i32
  }
  func.func @transform_3(%arg0: i32) -> (i32, i32) {
    %c0_i32 = arith.constant 0 : i32
    %c0_i32_0 = arith.constant 0 : i32
    return %arg0, %c0_i32 : i32, i32
  }
}

</mosaic_0001>

<bundles_post_ra>
// kernel: tpu_custom_call.1
= control target key start
LH: loop header
LB: loop body
LE: loop exit
PB: predicated region body
PF: predicated region fallthrough
CT: control target
= control target key end

     0   :  { %8 = vsyncpa [#allocation3], 0  ;;  %s474_s0 = inlined_call_operand.hbm [shape: f32[4,128], index: 0, kind: input, shape index: {}]   ;;  %s475_s1 = inlined_call_operand.hbm [shape: f32[1,32], index: 1, kind: input, shape index: {}]   ;;  %s476_s2 = inlined_call_operand.vmem [shape: f32[1,32], index: 2, kind: input, shape index: {}]   ;;  %s477_s3 = inlined_call_operand.hbm [shape: f32[4,128], index: 3, kind: output, shape index: {}]  }
   0x1   :  { %9 = vsyncpa [#allocation6], 0 }
   0x2   :  { %10 = vsyncpa [#allocation4], 0  ;;  %s16_s14 = sshll.u32 %s474_s0, 4  ;;  %s399_s15 = smov [#allocation2]   ;;  %s17_s14 = int_to_ptr.hbm [resolvable:$true] %s16_s14 }
   0x3   :  { %s18_s16 = sshll.u32 %s399_s15, 4  ;;  %s27_s19 = sshll.u32 %s475_s1, 4  ;;  %s19_s16 = int_to_ptr.vmem [resolvable:$true] %s18_s16  ;;  %s28_s19 = int_to_ptr.hbm [resolvable:$true] %s27_s19 }
   0x4   :  { %21 = dma.hbm_to_vmem [thread:$0]  %s17_s14, 64, %s19_s16, [#allocation3]  }
   0x5   :  { %s400_s20 = smov [#allocation5]  }
   0x6   :  { %s29_s21 = sshll.u32 %s400_s20, 4  ;;  %s30_s21 = int_to_ptr.vmem [resolvable:$true] %s29_s21 }
   0x7   :  { %32 = dma.hbm_to_vmem [thread:$0]  %s28_s19, 16, %s30_s21, [#allocation6]  }
   0x8   :  { %393 = dma.done.wait [#allocation3], 64  }
   0x9   :  { %394 = vsyncadd [#allocation3], 4294967232 }
   0xa   :  { %395 = dma.done.wait [#allocation6], 16  }
   0xb   :  { %396 = vsyncadd [#allocation6], 4294967280  ;;  %v102_v0 = vld [vmem:[#allocation2] sm:$0xf]  ;;  %s401_s0 = smov 96   ;;  %s402_s22 = smov 32  }
   0xc   :  { %v218_v1 = vld [vmem:[#allocation2] sm:$0xf]  ;;  %104 = vrot.lane.b32.xlu0 %v102_v0, %s401_s0  ;;  %s403_s1 = smov 64   ;;  %vm46_vm0 = vcmask 257024   ;;  %v404_v11 = vmov 32.0   ;;  %s283_s28 = sshll.u32 %s477_s3, 4  ;;  %s284_s28 = int_to_ptr.hbm [resolvable:$true] %s283_s28 }
   0xd   :  { %220 = vrot.lane.b32.xlu1 %v218_v1, %s402_s22  ;;  %v160_v2 = vld [vmem:[#allocation2] sm:$0xf]  ;;  %303 = vrcp.f32 %v404_v11  ;;  %v301_v39 = vld [vmem:[#allocation5] ss:$0 sm:$0xff] }
   0xe   :  { %v45_v3 = vld [vmem:[#allocation2] sm:$0xf] }
   0xf   :  { %v47_v4 = vsel %vm46_vm0, %v45_v3, 0.0  ;;  %v302_v49 = vld [vmem:[%s476_s2] ss:$0 sm:$0xff]  ;;  %s405_s2 = smov [#allocation7]  }
  0x10   :  { %s281_s25 = sshll.u32 %s405_s2, 4  ;;  %s282_s25 = int_to_ptr.vmem [resolvable:$true] %s281_s25 }
  0x13   :  { %v304_v12 = vpop.eup %303 }
  0x14   :  { %162 = vrot.lane.b32.xlu0 %v160_v2, %s403_s1  ;;  %v51_v13 = vmul.f32 32.0, %v304_v12  ;;  %vm55_vm1 = vweird.f32 %v304_v12 }
  0x16   :  { %v52_v14 = vsub.f32 1.0, %v51_v13 }
  0x18   :  { %v53_v15 = vmul.f32 %v304_v12, %v52_v14 }
  0x1a   :  { %v54_v16 = vadd.f32 %v304_v12, %v53_v15 }
  0x1c   :  { %v56_v17 = vsel %vm55_vm1, %v304_v12, %v54_v16 }
  0x3e   :  { %48 = vadd.xlane.f32.xlu0 %v47_v4 }
  0x52   :  { %150 = vrot.lane.b32.xlu0 %v301_v39, %s402_s22 }
  0x5a   :  { %208 = vrot.lane.b32.xlu0 %v301_v39, %s403_s1 }
  0x62   :  { %212 = vrot.lane.b32.xlu0 %v302_v49, %s403_s1 }
  0x6a   :  { %266 = vrot.lane.b32.xlu0 %v301_v39, %s401_s0 }
  0x7e   :  { %v105_v5 = vpop.permute.xlu0 %104 }
  0x7f   :  { %v107_v6 = vsel %vm46_vm0, %v105_v5, 0.0  ;;  %v221_v9 = vpop.permute.xlu1 %220 }
  0x80   :  { %108 = vadd.xlane.f32.xlu1 %v107_v6  ;;  %v223_v10 = vsel %vm46_vm0, %v221_v9, 0.0 }
  0x86   :  { %v163_v7 = vpop.permute.xlu0 %162 }
  0x87   :  { %v165_v8 = vsel %vm46_vm0, %v163_v7, 0.0 }
  0x88   :  { %166 = vadd.xlane.f32.xlu2 %v165_v8 }
  0x90   :  { %224 = vadd.xlane.f32.xlu2 %v223_v10 }
  0xb1   :  { %v49_v18 = vpop.xlane.xlu0 %48 }
  0xb2   :  { %v57_v19 = vmul.f32 %v56_v17, %v49_v18 }
  0xb4   :  { %v58_v20 = vsub.f32 %v45_v3, %v57_v19 }
  0xb6   :  { %v59_v21 = vmul.f32 %v58_v20, %v58_v20 }
  0xb8   :  { %v60_v22 = vsel %vm46_vm0, %v59_v21, 0.0 }
  0xb9   :  { %61 = vadd.xlane.f32.xlu1 %v60_v22 }
  0xf3   :  { %v109_v23 = vpop.xlane.xlu1 %108 }
  0xf4   :  { %v110_v24 = vmul.f32 %v109_v23, %v56_v17 }
  0xf6   :  { %v440_v25 = vsub.f32 %v102_v0, %v110_v24 }
  0xf8   :  { %v112_v26 = vmul.f32 %v440_v25, %v440_v25 }
  0xfa   :  { %114 = vrot.lane.b32.xlu2 %v112_v26, %s401_s0 }
  0xfb   :  { %v167_v27 = vpop.xlane.xlu2 %166 }
  0xfc   :  { %v168_v28 = vmul.f32 %v167_v27, %v56_v17 }
  0xfe   :  { %v445_v29 = vsub.f32 %v160_v2, %v168_v28 }
 0x100   :  { %v170_v30 = vmul.f32 %v445_v29, %v445_v29 }
 0x102   :  { %172 = vrot.lane.b32.xlu2 %v170_v30, %s403_s1 }
 0x103   :  { %v225_v31 = vpop.xlane.xlu2 %224 }
 0x104   :  { %v226_v32 = vmul.f32 %v225_v31, %v56_v17 }
 0x106   :  { %v450_v33 = vsub.f32 %v218_v1, %v226_v32 }
 0x108   :  { %v228_v34 = vmul.f32 %v450_v33, %v450_v33 }
 0x10a   :  { %230 = vrot.lane.b32.xlu2 %v228_v34, %s402_s22 }
 0x12c   :  { %v62_v35 = vpop.xlane.xlu1 %61 }
 0x12d   :  { %v63_v36 = vmul.f32 0.032258064, %v62_v35  ;;  %v151_v35 = vpop.permute.xlu0 %150 }
 0x12f   :  { %305 = vrsqrt.f32 %v63_v36  ;;  %vm71_vm2 = vcmp.eq.f32.partialorder %v63_v36, inf  ;;  %v74_v44 = vand.u32 2147483648, %v63_v36  ;;  %vm73_vm3 = vcmp.eq.f32.partialorder %v63_v36, 0.0 }
 0x135   :  { %v306_v37 = vpop.eup %305 }
 0x136   :  { %v65_v38 = vmul.f32 %v306_v37, %v63_v36 }
 0x138   :  { %v66_v40 = vmul.f32 %v306_v37, %v65_v38 }
 0x13a   :  { %v67_v41 = vmul.f32 0.5, %v66_v40 }
 0x13c   :  { %v68_v42 = vsub.f32 1.5, %v67_v41 }
 0x13e   :  { %v69_v43 = vmul.f32 %v306_v37, %v68_v42 }
 0x140   :  { %v70_v45 = vmul.f32 %v69_v43, %v63_v36 }
 0x142   :  { %v72_v46 = vsel %vm71_vm2, %v63_v36, %v70_v45 }
 0x143   :  { %v75_v47 = vsel %vm73_vm3, %v74_v44, %v72_v46  ;;  %vm158_vm3 = vcmask 519424  }
 0x144   :  { %v76_v48 = vadd.f32 1e-06, %v75_v47 }
 0x146   :  { %307 = vrcp.f32 %v76_v48  ;;  %v88_v52 = vand.u32 2147483648, %v76_v48  ;;  %vm82_vm4 = vweird.f32 %v76_v48  ;;  %v86_v54 = vand.u32 2147483647, %v76_v48 }
 0x148   :  { %v89_v56 = vor.u32 1.1754944e-38, %v88_v52  ;;  %vm87_vm7 = vcmp.eq.f32.partialorder %v86_v54, 8.507059e+37 }
 0x14c   :  { %v308_v50 = vpop.eup %307 }
 0x14d   :  { %v78_v51 = vmul.f32 %v308_v50, %v76_v48  ;;  %vm83_vm5 = vweird.f32 %v308_v50 }
 0x14e   :  { %vm84_vm6 = vmor %vm82_vm4, %vm83_vm5 }
 0x14f   :  { %v79_v53 = vsub.f32 1.0, %v78_v51  ;;  %v209_v51 = vpop.permute.xlu0 %208 }
 0x151   :  { %v80_v55 = vmul.f32 %v308_v50, %v79_v53 }
 0x153   :  { %v81_v57 = vadd.f32 %v308_v50, %v80_v55 }
 0x154   :  { %v115_v58 = vpop.permute.xlu2 %114 }
 0x155   :  { %v117_v59 = vsel %vm46_vm0, %v115_v58, 0.0  ;;  %v85_v60 = vsel %vm84_vm6, %v308_v50, %v81_v57 }
 0x156   :  { %118 = vadd.xlane.f32.xlu2 %v117_v59  ;;  %v90_v61 = vsel %vm87_vm7, %v89_v56, %v85_v60 }
 0x157   :  { %v92_v62 = vmul.f32 %v90_v61, %v58_v20 }
 0x159   :  { %v96_v63 = vmul.f32 %v301_v39, %v92_v62 }
 0x15b   :  { %v100_v0 = vadd.f32 %v302_v49, %v96_v63 }
 0x15c   :  { %v173_v1 = vpop.permute.xlu2 %172 }
 0x15d   :  { %v175_v2 = vsel %vm46_vm0, %v173_v1, 0.0  ;;  %101 = vst.msk [vmem:[#allocation7] sm:$0xf] %vm46_vm0, %v100_v0 }
 0x15e   :  { %176 = vadd.xlane.f32.xlu1 %v175_v2 }
 0x164   :  { %v231_v3 = vpop.permute.xlu2 %230 }
 0x165   :  { %v233_v4 = vsel %vm46_vm0, %v231_v3, 0.0 }
 0x166   :  { %234 = vadd.xlane.f32.xlu1 %v233_v4 }
 0x16e   :  { %270 = vrot.lane.b32.xlu2 %v302_v49, %s401_s0 }
 0x17f   :  { %154 = vrot.lane.b32.xlu1 %v302_v49, %s402_s22 }
 0x1c9   :  { %v119_v5 = vpop.xlane.xlu2 %118 }
 0x1ca   :  { %v120_v6 = vmul.f32 0.032258064, %v119_v5 }
 0x1cc   :  { %309 = vrsqrt.f32 %v120_v6  ;;  %vm128_vm8 = vcmp.eq.f32.partialorder %v120_v6, inf  ;;  %v131_v21 = vand.u32 2147483648, %v120_v6  ;;  %vm130_vm9 = vcmp.eq.f32.partialorder %v120_v6, 0.0 }
 0x1d1   :  { %v177_v7 = vpop.xlane.xlu1 %176 }
 0x1d2   :  { %v310_v8 = vpop.eup %309  ;;  %v178_v9 = vmul.f32 0.032258064, %v177_v7 }
 0x1d3   :  { %v122_v10 = vmul.f32 %v310_v8, %v120_v6 }
 0x1d4   :  { %311 = vrsqrt.f32 %v178_v9  ;;  %vm186_vm10 = vcmp.eq.f32.partialorder %v178_v9, inf  ;;  %v189_v36 = vand.u32 2147483648, %v178_v9  ;;  %vm188_vm11 = vcmp.eq.f32.partialorder %v178_v9, 0.0 }
 0x1d5   :  { %v123_v11 = vmul.f32 %v310_v8, %v122_v10 }
 0x1d7   :  { %v124_v12 = vmul.f32 0.5, %v123_v11 }
 0x1d9   :  { %v125_v13 = vsub.f32 1.5, %v124_v12  ;;  %v235_v14 = vpop.xlane.xlu1 %234 }
 0x1da   :  { %v312_v15 = vpop.eup %311  ;;  %v236_v16 = vmul.f32 0.032258064, %v235_v14 }
 0x1db   :  { %v126_v17 = vmul.f32 %v310_v8, %v125_v13  ;;  %v180_v18 = vmul.f32 %v312_v15, %v178_v9  ;;  %v213_v8 = vpop.permute.xlu0 %212 }
 0x1dc   :  { %313 = vrsqrt.f32 %v236_v16  ;;  %vm244_vm12 = vcmp.eq.f32.partialorder %v236_v16, inf  ;;  %v247_v50 = vand.u32 2147483648, %v236_v16  ;;  %vm246_vm14 = vcmp.eq.f32.partialorder %v236_v16, 0.0 }
 0x1dd   :  { %v127_v19 = vmul.f32 %v126_v17, %v120_v6  ;;  %v181_v20 = vmul.f32 %v312_v15, %v180_v18 }
 0x1df   :  { %v182_v22 = vmul.f32 0.5, %v181_v20  ;;  %v129_v23 = vsel %vm128_vm8, %v120_v6, %v127_v19  ;;  %vm216_vm8 = vcmask 781824  }
 0x1e0   :  { %v132_v24 = vsel %vm130_vm9, %v131_v21, %v129_v23 }
 0x1e1   :  { %v183_v26 = vsub.f32 1.5, %v182_v22  ;;  %v133_v27 = vadd.f32 1e-06, %v132_v24 }
 0x1e2   :  { %v314_v28 = vpop.eup %313 }
 0x1e3   :  { %v184_v30 = vmul.f32 %v312_v15, %v183_v26  ;;  %v238_v31 = vmul.f32 %v314_v28, %v236_v16  ;;  %315 = vrcp.f32 %v133_v27  ;;  %v145_v47 = vand.u32 2147483648, %v133_v27  ;;  %v267_v22 = vpop.permute.xlu0 %266 }
 0x1e4   :  { %v143_v49 = vand.u32 2147483647, %v133_v27  ;;  %vm139_vm15 = vweird.f32 %v133_v27 }
 0x1e5   :  { %v185_v32 = vmul.f32 %v184_v30, %v178_v9  ;;  %v239_v34 = vmul.f32 %v314_v28, %v238_v31  ;;  %v146_v56 = vor.u32 1.1754944e-38, %v145_v47 }
 0x1e6   :  { %vm144_vm1 = vcmp.eq.f32.partialorder %v143_v49, 8.507059e+37 }
 0x1e7   :  { %v240_v37 = vmul.f32 0.5, %v239_v34  ;;  %v187_v38 = vsel %vm186_vm10, %v178_v9, %v185_v32 }
 0x1e8   :  { %v190_v39 = vsel %vm188_vm11, %v189_v36, %v187_v38 }
 0x1e9   :  { %v316_v40 = vpop.eup %315  ;;  %v241_v41 = vsub.f32 1.5, %v240_v37  ;;  %v191_v42 = vadd.f32 1e-06, %v190_v39 }
 0x1ea   :  { %v135_v43 = vmul.f32 %v316_v40, %v133_v27  ;;  %vm140_vm13 = vweird.f32 %v316_v40 }
 0x1eb   :  { %v242_v44 = vmul.f32 %v314_v28, %v241_v41  ;;  %317 = vrcp.f32 %v191_v42  ;;  %vm141_vm0 = vmor %vm139_vm15, %vm140_vm13  ;;  %v203_v63 = vand.u32 2147483648, %v191_v42  ;;  %v201_v3 = vand.u32 2147483647, %v191_v42 }
 0x1ec   :  { %v136_v45 = vsub.f32 1.0, %v135_v43  ;;  %vm197_vm4 = vweird.f32 %v191_v42 }
 0x1ed   :  { %v243_v46 = vmul.f32 %v242_v44, %v236_v16  ;;  %v204_v7 = vor.u32 1.1754944e-38, %v203_v63  ;;  %vm202_vm6 = vcmp.eq.f32.partialorder %v201_v3, 8.507059e+37 }
 0x1ee   :  { %v137_v48 = vmul.f32 %v316_v40, %v136_v45 }
 0x1ef   :  { %v245_v52 = vsel %vm244_vm12, %v236_v16, %v243_v46  ;;  %vm274_vm12 = vcmask 1044224  }
 0x1f0   :  { %v138_v53 = vadd.f32 %v316_v40, %v137_v48  ;;  %v248_v54 = vsel %vm246_vm14, %v247_v50, %v245_v52 }
 0x1f1   :  { %v318_v55 = vpop.eup %317  ;;  %v249_v57 = vadd.f32 1e-06, %v248_v54  ;;  %v155_v0 = vpop.permute.xlu1 %154 }
 0x1f2   :  { %v142_v58 = vsel %vm141_vm0, %v316_v40, %v138_v53  ;;  %v193_v59 = vmul.f32 %v318_v55, %v191_v42  ;;  %vm198_vm2 = vweird.f32 %v318_v55 }
 0x1f3   :  { %v147_v60 = vsel %vm144_vm1, %v146_v56, %v142_v58  ;;  %319 = vrcp.f32 %v249_v57  ;;  %vm199_vm5 = vmor %vm197_vm4, %vm198_vm2  ;;  %v261_v13 = vand.u32 2147483648, %v249_v57  ;;  %v259_v16 = vand.u32 2147483647, %v249_v57 }
 0x1f4   :  { %v149_v61 = vmul.f32 %v147_v60, %v440_v25  ;;  %v194_v62 = vsub.f32 1.0, %v193_v59  ;;  %vm255_vm9 = vweird.f32 %v249_v57 }
 0x1f5   :  { %v262_v19 = vor.u32 1.1754944e-38, %v261_v13  ;;  %vm260_vm11 = vcmp.eq.f32.partialorder %v259_v16, 8.507059e+37 }
 0x1f6   :  { %v153_v1 = vmul.f32 %v151_v35, %v149_v61  ;;  %v195_v2 = vmul.f32 %v318_v55, %v194_v62 }
 0x1f8   :  { %v196_v4 = vadd.f32 %v318_v55, %v195_v2  ;;  %v157_v5 = vadd.f32 %v155_v0, %v153_v1 }
 0x1f9   :  { %v320_v6 = vpop.eup %319 }
 0x1fa   :  { %v200_v9 = vsel %vm199_vm5, %v318_v55, %v196_v4  ;;  %159 = vst.msk [vmem:[#allocation7] sm:$0xf] %vm158_vm3, %v157_v5  ;;  %v251_v10 = vmul.f32 %v320_v6, %v249_v57  ;;  %vm256_vm7 = vweird.f32 %v320_v6 }
 0x1fb   :  { %v205_v25 = vsel %vm202_vm6, %v204_v7, %v200_v9  ;;  %vm257_vm10 = vmor %vm255_vm9, %vm256_vm7 }
 0x1fc   :  { %v207_v11 = vmul.f32 %v205_v25, %v445_v29  ;;  %v252_v12 = vsub.f32 1.0, %v251_v10  ;;  %v271_v29 = vpop.permute.xlu2 %270 }
 0x1fe   :  { %v211_v14 = vmul.f32 %v209_v51, %v207_v11  ;;  %v253_v15 = vmul.f32 %v320_v6, %v252_v12 }
 0x200   :  { %v215_v17 = vadd.f32 %v213_v8, %v211_v14  ;;  %v254_v18 = vadd.f32 %v320_v6, %v253_v15 }
 0x202   :  { %v258_v20 = vsel %vm257_vm10, %v320_v6, %v254_v18  ;;  %217 = vst.msk [vmem:[#allocation7] sm:$0xf] %vm216_vm8, %v215_v17 }
 0x203   :  { %v263_v21 = vsel %vm260_vm11, %v262_v19, %v258_v20 }
 0x204   :  { %v265_v23 = vmul.f32 %v263_v21, %v450_v33 }
 0x206   :  { %v269_v24 = vmul.f32 %v267_v22, %v265_v23 }
 0x208   :  { %v273_v26 = vadd.f32 %v271_v29, %v269_v24 }
 0x20a   :  { %275 = vst.msk [vmem:[#allocation7] sm:$0xf] %vm274_vm12, %v273_v26 }
 0x20b   :  { %286 = dma.vmem_to_hbm [thread:$0]  %s282_s25, 64, %s284_s28, [#allocation4]  }
 0x20c   :  { %397 = dma.done.wait [#allocation4], 64  }
 0x20d   :  { %398 = vsyncadd [#allocation4], 4294967232 }
 0x20e   :  { %291 = vsyncpa [#allocation3], 1 }
 0x20f   :  { %292 = vsyncpa [#allocation6], 1 }
 0x210   :  { %293 = vsyncpa [#allocation4], 1 }

</bundles_post_ra>
